<compile_context>
chip_gen: v6e
topology: v6e:2x2x1
jax: 0.10.0
libtpu: 0.0.40
codegen_flags: <defaults>
</compile_context>

<pallas_src>
import math
import functools

import jax
import jax.numpy as jnp
from jax import lax
from jax.experimental import pallas as pl
from jax.experimental.pallas import tpu as pltpu


def _transformer_block_kernel(
    x_ref,                       # (1, S, H)  f32
    ln1_g_ref, ln1_b_ref,        # (1, H)     f32
    wqkv_ref, bqkv_ref,          # (H, 3H) bf16 (pre-transposed), (1, 3H) f32
    wo_ref, bo_ref,              # (H, H)  bf16 (pre-transposed), (1, H)  f32
    ln2_g_ref, ln2_b_ref,        # (1, H)     f32
    w1_ref, b1_ref,              # (H, 4H) bf16 (pre-transposed), (1, 4H) f32
    w2_ref, b2_ref,              # (4H, H) bf16 (pre-transposed), (1, H)  f32
    o_ref,                       # (1, S, H)  f32
    qh_s, kh_s, vh_s,            # VMEM scratch (nh, S, hd)  mxu dtype
    attn_s,                      # VMEM scratch (S, H)       mxu dtype
    *, num_head: int,
):
    eps = 1e-5
    x = x_ref[0].astype(jnp.float32)                 # (S, H)
    S, H = x.shape
    hd = H // num_head
    scale = 1.0 / math.sqrt(hd)
    mxu_dtype = wqkv_ref.dtype                       # bf16 (or f32 for strict parity)

    # ---- LayerNorm 1 (f32 statistics) ----
    mu = jnp.mean(x, axis=-1, keepdims=True)
    var = jnp.mean(jnp.square(x - mu), axis=-1, keepdims=True)
    xn = (x - mu) * lax.rsqrt(var + eps) * ln1_g_ref[0] + ln1_b_ref[0]

    # ---- fused QKV projection (weights pre-transposed: y = x @ Wt + b) ----
    qkv = jnp.dot(xn.astype(mxu_dtype), wqkv_ref[...],
                  preferred_element_type=jnp.float32) + bqkv_ref[0]      # (S, 3H) f32

    # ---- scatter heads into head-major (nh, S, hd) scratch (layout copies only) ----
    for h in range(num_head):                        # static loop: slices/stores, no matmuls
        qh_s[h] = qkv[:, 0 * H + h * hd: 0 * H + (h + 1) * hd].astype(qh_s.dtype)
        kh_s[h] = qkv[:, 1 * H + h * hd: 1 * H + (h + 1) * hd].astype(kh_s.dtype)
        vh_s[h] = qkv[:, 2 * H + h * hd: 2 * H + (h + 1) * hd].astype(vh_s.dtype)

    # ---- additive causal mask (computed once, shared by all heads) ----
    row = lax.broadcasted_iota(jnp.int32, (S, S), 0)
    col = lax.broadcasted_iota(jnp.int32, (S, S), 1)
    mask = jnp.where(col > row, jnp.float32(-1e30), jnp.float32(0.0))    # (S, S)

    # ---- batched multi-head attention: one einsum over all heads ----
    s = jnp.einsum('nqd,nkd->nqk', qh_s[...], kh_s[...],
                   preferred_element_type=jnp.float32) * scale + mask    # (nh, S, S) f32
    m = jnp.max(s, axis=-1, keepdims=True)
    e = jnp.exp(s - m)
    denom = jnp.sum(e, axis=-1, keepdims=True)
    p = e * pl.reciprocal(denom, approx=True)                            # softmax probs (f32)
    ctx = jnp.einsum('nqk,nkd->nqd', p.astype(mxu_dtype), vh_s[...],
                     preferred_element_type=jnp.float32)                 # (nh, S, hd) f32

    # ---- gather heads back to (S, H) scratch (no concatenate) ----
    for h in range(num_head):
        attn_s[:, h * hd:(h + 1) * hd] = ctx[h].astype(attn_s.dtype)

    # ---- output projection + residual ----
    attn_out = jnp.dot(attn_s[...], wo_ref[...],
                       preferred_element_type=jnp.float32) + bo_ref[0]
    res1 = x + attn_out

    # ---- LayerNorm 2 ----
    mu2 = jnp.mean(res1, axis=-1, keepdims=True)
    var2 = jnp.mean(jnp.square(res1 - mu2), axis=-1, keepdims=True)
    xn2 = (res1 - mu2) * lax.rsqrt(var2 + eps) * ln2_g_ref[0] + ln2_b_ref[0]

    # ---- FFN: Linear(H,4H) -> exact (erf) GELU -> Linear(4H,H) ----
    h1 = jnp.dot(xn2.astype(mxu_dtype), w1_ref[...],
                 preferred_element_type=jnp.float32) + b1_ref[0]         # (S, 4H) f32
    g = 0.5 * h1 * (1.0 + lax.erf(h1 * (1.0 / math.sqrt(2.0))))          # matches nn.GELU default
    ffn = jnp.dot(g.astype(mxu_dtype), w2_ref[...],
                  preferred_element_type=jnp.float32) + b2_ref[0]

    o_ref[0] = (res1 + ffn).astype(o_ref.dtype)


def transformer_block(x_sbh, params, *, num_head: int, mxu_dtype=jnp.bfloat16):
    """x_sbh: (S, B, H) float32, matching the PyTorch (seq, batch, hidden) layout."""
    S, B, H = x_sbh.shape
    hd = H // num_head
    x_bsh = jnp.transpose(x_sbh, (1, 0, 2))          # (B, S, H)

    (ln1_g, ln1_b, wqkv, bqkv, wo, bo,
     ln2_g, ln2_b, w1, b1, w2, b2) = params

    # Pre-transpose weights ONCE (PyTorch y = x @ W.T + b  ==  x @ W_t + b) and cast
    # the matmul operands to the MXU dtype; biases / LN params stay f32 as (1, N) rows.
    row2d = lambda a: a.reshape(1, -1).astype(jnp.float32)
    wqkv_t = wqkv.T.astype(mxu_dtype)                # (H, 3H)
    wo_t = wo.T.astype(mxu_dtype)                    # (H, H)
    w1_t = w1.T.astype(mxu_dtype)                    # (H, 4H)
    w2_t = w2.T.astype(mxu_dtype)                    # (4H, H)

    weight_args = (
        row2d(ln1_g), row2d(ln1_b),
        wqkv_t, row2d(bqkv),
        wo_t, row2d(bo),
        row2d(ln2_g), row2d(ln2_b),
        w1_t, row2d(b1),
        w2_t, row2d(b2),
    )

    # All weights are 2-D and grid-invariant (constant index_map -> single DMA).
    def full_spec(arr):
        return pl.BlockSpec(arr.shape, lambda b: (0, 0))

    kernel = functools.partial(_transformer_block_kernel, num_head=num_head)

    out_bsh = pl.pallas_call(
        kernel,
        out_shape=jax.ShapeDtypeStruct((B, S, H), x_sbh.dtype),
        grid_spec=pltpu.PrefetchScalarGridSpec(
            num_scalar_prefetch=0,
            grid=(B,),
            in_specs=[pl.BlockSpec((1, S, H), lambda b: (b, 0, 0))]
                     + [full_spec(a) for a in weight_args],
            out_specs=pl.BlockSpec((1, S, H), lambda b: (b, 0, 0)),
            scratch_shapes=[
                pltpu.VMEM((num_head, S, hd), mxu_dtype),   # q (head-major)
                pltpu.VMEM((num_head, S, hd), mxu_dtype),   # k
                pltpu.VMEM((num_head, S, hd), mxu_dtype),   # v
                pltpu.VMEM((S, H), mxu_dtype),              # merged attention output
            ],
        ),
        compiler_params=pltpu.CompilerParams(
            dimension_semantics=("parallel",),              # shards batch across TCs (v7x)
            vmem_limit_bytes=32 * 1024 * 1024,              # explicit budget, safe on 64 MiB v7x
        ),
    )(x_bsh, *weight_args)

    return jnp.transpose(out_bsh, (1, 0, 2))                # back to (S, B, H)


def init_params(key, hidden_dim):
    H = hidden_dim
    ks = jax.random.split(key, 8)
    scale = 0.02
    ln1_g = jnp.ones((H,), jnp.float32)
    ln1_b = jnp.zeros((H,), jnp.float32)
    wqkv = scale * jax.random.normal(ks[0], (3 * H, H), jnp.float32)
    bqkv = scale * jax.random.normal(ks[1], (3 * H,), jnp.float32)
    wo = scale * jax.random.normal(ks[2], (H, H), jnp.float32)
    bo = scale * jax.random.normal(ks[3], (H,), jnp.float32)
    ln2_g = jnp.ones((H,), jnp.float32)
    ln2_b = jnp.zeros((H,), jnp.float32)
    w1 = scale * jax.random.normal(ks[4], (4 * H, H), jnp.float32)
    b1 = scale * jax.random.normal(ks[5], (4 * H,), jnp.float32)
    w2 = scale * jax.random.normal(ks[6], (H, 4 * H), jnp.float32)
    b2 = scale * jax.random.normal(ks[7], (H,), jnp.float32)
    return (ln1_g, ln1_b, wqkv, bqkv, wo, bo, ln2_g, ln2_b, w1, b1, w2, b2)


def _reference(x_sbh, params, num_head):
    """Pure-JAX f32 reference mirroring the PyTorch module (eval mode)."""
    (ln1_g, ln1_b, wqkv, bqkv, wo, bo, ln2_g, ln2_b, w1, b1, w2, b2) = params
    S, B, H = x_sbh.shape
    hd = H // num_head

    def ln(z, g, b):
        mu = jnp.mean(z, -1, keepdims=True)
        var = jnp.mean((z - mu) ** 2, -1, keepdims=True)
        return (z - mu) / jnp.sqrt(var + 1e-5) * g + b

    x = x_sbh
    xn = ln(x, ln1_g, ln1_b)
    qkv = xn @ wqkv.T + bqkv
    q, k, v = qkv[..., :H], qkv[..., H:2 * H], qkv[..., 2 * H:]

    def split(t):  # (S,B,H) -> (B, nh, S, hd)
        return t.reshape(S, B, num_head, hd).transpose(1, 2, 0, 3)

    qh, kh, vh = split(q), split(k), split(v)
    scores = jnp.einsum('bnqd,bnkd->bnqk', qh, kh) / jnp.sqrt(jnp.float32(hd))
    causal = jnp.triu(jnp.ones((S, S), bool), k=1)
    scores = jnp.where(causal, -jnp.inf, scores)
    p = jax.nn.softmax(scores, axis=-1)
    ctx = jnp.einsum('bnqk,bnkd->bnqd', p, vh)
    ctx = ctx.transpose(2, 0, 1, 3).reshape(S, B, H)
    attn_out = ctx @ wo.T + bo
    res1 = x + attn_out
    xn2 = ln(res1, ln2_g, ln2_b)
    h1 = xn2 @ w1.T + b1
    g = 0.5 * h1 * (1.0 + lax.erf(h1 / jnp.sqrt(jnp.float32(2.0))))
    return res1 + (g @ w2.T + b2)


if __name__ == "__main__":
    # Small shapes implied by the module: seq=8, batch=2, hidden=32, heads=4.
    S, B, H, NH = 8, 2, 32, 4
    key = jax.random.PRNGKey(0)
    kx, kp = jax.random.split(key)
    x = jax.random.normal(kx, (S, B, H), jnp.float32)      # (seq, batch, hidden)
    params = init_params(kp, H)

    out = transformer_block(x, params, num_head=NH)
    out = jax.block_until_ready(out)

    ref = _reference(x, params, NH)
    assert out.shape == (S, B, H) and out.dtype == jnp.float32
    assert bool(jnp.all(jnp.isfinite(out)))
    # bf16 MXU operands + approx reciprocal -> compare against f32 ref with loose tol.
    assert bool(jnp.allclose(out, ref, atol=5e-2, rtol=5e-2))
    print("KERNEL_OK")
</pallas_src>

<mosaic_0001>
module attributes {stable_mosaic.version = 11 : i64} {
  func.func @_transformer_block_kernel(%arg0: i32, %arg1: memref<1x8x32xf32, #tpu.memory_space<vmem>>, %arg2: memref<1x32xf32, #tpu.memory_space<vmem>>, %arg3: memref<1x32xf32, #tpu.memory_space<vmem>>, %arg4: memref<32x96xbf16, #tpu.memory_space<vmem>>, %arg5: memref<1x96xf32, #tpu.memory_space<vmem>>, %arg6: memref<32x32xbf16, #tpu.memory_space<vmem>>, %arg7: memref<1x32xf32, #tpu.memory_space<vmem>>, %arg8: memref<1x32xf32, #tpu.memory_space<vmem>>, %arg9: memref<1x32xf32, #tpu.memory_space<vmem>>, %arg10: memref<32x128xbf16, #tpu.memory_space<vmem>>, %arg11: memref<1x128xf32, #tpu.memory_space<vmem>>, %arg12: memref<128x32xbf16, #tpu.memory_space<vmem>>, %arg13: memref<1x32xf32, #tpu.memory_space<vmem>>, %arg14: memref<1x8x32xf32, #tpu.memory_space<vmem>>, %arg15: memref<4x8x8xbf16, #tpu.memory_space<vmem>>, %arg16: memref<4x8x8xbf16, #tpu.memory_space<vmem>>, %arg17: memref<4x8x8xbf16, #tpu.memory_space<vmem>>, %arg18: memref<8x32xbf16, #tpu.memory_space<vmem>>) attributes {dimension_semantics = [#tpu.dimension_semantics<parallel>], iteration_bounds = array<i64: 2>, scalar_prefetch = 0 : i64, scratch_operands = 4 : i64, tpu.core_type = #tpu.core_type<tc>, window_params = [{transform_indices = @transform_0, window_bounds = array<i64: 1, 8, 32>}, {pipeline_mode = #tpu.pipeline_mode<synchronous>, transform_indices = @transform_1, window_bounds = array<i64: 1, 32>}, {pipeline_mode = #tpu.pipeline_mode<synchronous>, transform_indices = @transform_2, window_bounds = array<i64: 1, 32>}, {pipeline_mode = #tpu.pipeline_mode<synchronous>, transform_indices = @transform_3, window_bounds = array<i64: 32, 96>}, {pipeline_mode = #tpu.pipeline_mode<synchronous>, transform_indices = @transform_4, window_bounds = array<i64: 1, 96>}, {pipeline_mode = #tpu.pipeline_mode<synchronous>, transform_indices = @transform_5, window_bounds = array<i64: 32, 32>}, {pipeline_mode = #tpu.pipeline_mode<synchronous>, transform_indices = @transform_6, window_bounds = array<i64: 1, 32>}, {pipeline_mode = #tpu.pipeline_mode<synchronous>, transform_indices = @transform_7, window_bounds = array<i64: 1, 32>}, {pipeline_mode = #tpu.pipeline_mode<synchronous>, transform_indices = @transform_8, window_bounds = array<i64: 1, 32>}, {pipeline_mode = #tpu.pipeline_mode<synchronous>, transform_indices = @transform_9, window_bounds = array<i64: 32, 128>}, {pipeline_mode = #tpu.pipeline_mode<synchronous>, transform_indices = @transform_10, window_bounds = array<i64: 1, 128>}, {pipeline_mode = #tpu.pipeline_mode<synchronous>, transform_indices = @transform_11, window_bounds = array<i64: 128, 32>}, {pipeline_mode = #tpu.pipeline_mode<synchronous>, transform_indices = @transform_12, window_bounds = array<i64: 1, 32>}, {transform_indices = @transform_13, window_bounds = array<i64: 1, 8, 32>}]} {
    %c0 = arith.constant 0 : index
    %c0_0 = arith.constant 0 : index
    %c0_1 = arith.constant 0 : index
    %0 = vector.load %arg1[%c0, %c0_0, %c0_1] : memref<1x8x32xf32, #tpu.memory_space<vmem>>, vector<1x8x32xf32>
    %1 = vector.shape_cast %0 : vector<1x8x32xf32> to vector<8x32xf32>
    %cst = arith.constant dense<0.000000e+00> : vector<8xf32>
    %2 = vector.multi_reduction <add>, %1, %cst [1] : vector<8x32xf32> to vector<8xf32>
    %3 = vector.shape_cast %2 : vector<8xf32> to vector<8x1xf32>
    %cst_2 = arith.constant 3.200000e+01 : f32
    %4 = vector.broadcast %cst_2 : f32 to vector<8x1xf32>
    %5 = arith.divf %3, %4 : vector<8x1xf32>
    %6 = vector.broadcast %5 : vector<8x1xf32> to vector<8x32xf32>
    %7 = arith.subf %1, %6 : vector<8x32xf32>
    %8 = arith.mulf %7, %7 : vector<8x32xf32>
    %cst_3 = arith.constant dense<0.000000e+00> : vector<8xf32>
    %9 = vector.multi_reduction <add>, %8, %cst_3 [1] : vector<8x32xf32> to vector<8xf32>
    %10 = vector.shape_cast %9 : vector<8xf32> to vector<8x1xf32>
    %cst_4 = arith.constant 3.200000e+01 : f32
    %11 = vector.broadcast %cst_4 : f32 to vector<8x1xf32>
    %12 = arith.divf %10, %11 : vector<8x1xf32>
    %13 = vector.broadcast %5 : vector<8x1xf32> to vector<8x32xf32>
    %14 = arith.subf %1, %13 : vector<8x32xf32>
    %cst_5 = arith.constant 9.99999974E-6 : f32
    %15 = vector.broadcast %cst_5 : f32 to vector<8x1xf32>
    %16 = arith.addf %12, %15 : vector<8x1xf32>
    %17 = math.rsqrt %16 : vector<8x1xf32>
    %18 = vector.broadcast %17 : vector<8x1xf32> to vector<8x32xf32>
    %19 = arith.mulf %14, %18 : vector<8x32xf32>
    %c0_6 = arith.constant 0 : index
    %c0_7 = arith.constant 0 : index
    %20 = vector.load %arg2[%c0_6, %c0_7] : memref<1x32xf32, #tpu.memory_space<vmem>>, vector<1x32xf32>
    %21 = vector.shape_cast %20 : vector<1x32xf32> to vector<32xf32>
    %22 = vector.shape_cast %21 : vector<32xf32> to vector<1x32xf32>
    %23 = vector.broadcast %22 : vector<1x32xf32> to vector<8x32xf32>
    %24 = arith.mulf %19, %23 : vector<8x32xf32>
    %c0_8 = arith.constant 0 : index
    %c0_9 = arith.constant 0 : index
    %25 = vector.load %arg3[%c0_8, %c0_9] : memref<1x32xf32, #tpu.memory_space<vmem>>, vector<1x32xf32>
    %26 = vector.shape_cast %25 : vector<1x32xf32> to vector<32xf32>
    %27 = vector.shape_cast %26 : vector<32xf32> to vector<1x32xf32>
    %28 = vector.broadcast %27 : vector<1x32xf32> to vector<8x32xf32>
    %29 = arith.addf %24, %28 : vector<8x32xf32>
    %30 = arith.truncf %29 : vector<8x32xf32> to vector<8x32xbf16>
    %c0_10 = arith.constant 0 : index
    %c0_11 = arith.constant 0 : index
    %31 = vector.load %arg4[%c0_10, %c0_11] : memref<32x96xbf16, #tpu.memory_space<vmem>>, vector<32x96xbf16>
    %cst_12 = arith.constant dense<0.000000e+00> : vector<8x96xf32>
    %32 = tpu.matmul %30, %31, %cst_12 {dimension_numbers = #tpu.dot_dimension_numbers<[1], [0], [0], [1], [0, 0, 1, 1], [], []>} : vector<8x32xbf16>, vector<32x96xbf16>, vector<8x96xf32> -> vector<8x96xf32>
    %c0_13 = arith.constant 0 : index
    %c0_14 = arith.constant 0 : index
    %33 = vector.load %arg5[%c0_13, %c0_14] : memref<1x96xf32, #tpu.memory_space<vmem>>, vector<1x96xf32>
    %34 = vector.shape_cast %33 : vector<1x96xf32> to vector<96xf32>
    %35 = vector.shape_cast %34 : vector<96xf32> to vector<1x96xf32>
    %36 = vector.broadcast %35 : vector<1x96xf32> to vector<8x96xf32>
    %37 = arith.addf %32, %36 : vector<8x96xf32>
    %38 = vector.extract_strided_slice %37 {offsets = [0, 0], sizes = [8, 8], strides = [1, 1]} : vector<8x96xf32> to vector<8x8xf32>
    %39 = arith.truncf %38 : vector<8x8xf32> to vector<8x8xbf16>
    %c0_15 = arith.constant 0 : index
    %c0_16 = arith.constant 0 : index
    %c0_17 = arith.constant 0 : index
    %40 = vector.load %arg15[%c0_15, %c0_16, %c0_17] : memref<4x8x8xbf16, #tpu.memory_space<vmem>>, vector<1x8x8xbf16>
    %41 = vector.shape_cast %40 : vector<1x8x8xbf16> to vector<8x8xbf16>
    %42 = vector.shape_cast %39 : vector<8x8xbf16> to vector<1x8x8xbf16>
    tpu.vector_store %arg15[%c0_15, %c0_16, %c0_17], %42 {strides = array<i32>} : memref<4x8x8xbf16, #tpu.memory_space<vmem>>, vector<1x8x8xbf16>,
    %43 = vector.extract_strided_slice %37 {offsets = [0, 32], sizes = [8, 8], strides = [1, 1]} : vector<8x96xf32> to vector<8x8xf32>
    %44 = arith.truncf %43 : vector<8x8xf32> to vector<8x8xbf16>
    %c0_18 = arith.constant 0 : index
    %c0_19 = arith.constant 0 : index
    %c0_20 = arith.constant 0 : index
    %45 = vector.load %arg16[%c0_18, %c0_19, %c0_20] : memref<4x8x8xbf16, #tpu.memory_space<vmem>>, vector<1x8x8xbf16>
    %46 = vector.shape_cast %45 : vector<1x8x8xbf16> to vector<8x8xbf16>
    %47 = vector.shape_cast %44 : vector<8x8xbf16> to vector<1x8x8xbf16>
    tpu.vector_store %arg16[%c0_18, %c0_19, %c0_20], %47 {strides = array<i32>} : memref<4x8x8xbf16, #tpu.memory_space<vmem>>, vector<1x8x8xbf16>,
    %48 = vector.extract_strided_slice %37 {offsets = [0, 64], sizes = [8, 8], strides = [1, 1]} : vector<8x96xf32> to vector<8x8xf32>
    %49 = arith.truncf %48 : vector<8x8xf32> to vector<8x8xbf16>
    %c0_21 = arith.constant 0 : index
    %c0_22 = arith.constant 0 : index
    %c0_23 = arith.constant 0 : index
    %50 = vector.load %arg17[%c0_21, %c0_22, %c0_23] : memref<4x8x8xbf16, #tpu.memory_space<vmem>>, vector<1x8x8xbf16>
    %51 = vector.shape_cast %50 : vector<1x8x8xbf16> to vector<8x8xbf16>
    %52 = vector.shape_cast %49 : vector<8x8xbf16> to vector<1x8x8xbf16>
    tpu.vector_store %arg17[%c0_21, %c0_22, %c0_23], %52 {strides = array<i32>} : memref<4x8x8xbf16, #tpu.memory_space<vmem>>, vector<1x8x8xbf16>,
    %53 = vector.extract_strided_slice %37 {offsets = [0, 8], sizes = [8, 8], strides = [1, 1]} : vector<8x96xf32> to vector<8x8xf32>
    %54 = arith.truncf %53 : vector<8x8xf32> to vector<8x8xbf16>
    %c1 = arith.constant 1 : index
    %c0_24 = arith.constant 0 : index
    %c0_25 = arith.constant 0 : index
    %55 = vector.load %arg15[%c1, %c0_24, %c0_25] : memref<4x8x8xbf16, #tpu.memory_space<vmem>>, vector<1x8x8xbf16>
    %56 = vector.shape_cast %55 : vector<1x8x8xbf16> to vector<8x8xbf16>
    %57 = vector.shape_cast %54 : vector<8x8xbf16> to vector<1x8x8xbf16>
    tpu.vector_store %arg15[%c1, %c0_24, %c0_25], %57 {strides = array<i32>} : memref<4x8x8xbf16, #tpu.memory_space<vmem>>, vector<1x8x8xbf16>,
    %58 = vector.extract_strided_slice %37 {offsets = [0, 40], sizes = [8, 8], strides = [1, 1]} : vector<8x96xf32> to vector<8x8xf32>
    %59 = arith.truncf %58 : vector<8x8xf32> to vector<8x8xbf16>
    %c1_26 = arith.constant 1 : index
    %c0_27 = arith.constant 0 : index
    %c0_28 = arith.constant 0 : index
    %60 = vector.load %arg16[%c1_26, %c0_27, %c0_28] : memref<4x8x8xbf16, #tpu.memory_space<vmem>>, vector<1x8x8xbf16>
    %61 = vector.shape_cast %60 : vector<1x8x8xbf16> to vector<8x8xbf16>
    %62 = vector.shape_cast %59 : vector<8x8xbf16> to vector<1x8x8xbf16>
    tpu.vector_store %arg16[%c1_26, %c0_27, %c0_28], %62 {strides = array<i32>} : memref<4x8x8xbf16, #tpu.memory_space<vmem>>, vector<1x8x8xbf16>,
    %63 = vector.extract_strided_slice %37 {offsets = [0, 72], sizes = [8, 8], strides = [1, 1]} : vector<8x96xf32> to vector<8x8xf32>
    %64 = arith.truncf %63 : vector<8x8xf32> to vector<8x8xbf16>
    %c1_29 = arith.constant 1 : index
    %c0_30 = arith.constant 0 : index
    %c0_31 = arith.constant 0 : index
    %65 = vector.load %arg17[%c1_29, %c0_30, %c0_31] : memref<4x8x8xbf16, #tpu.memory_space<vmem>>, vector<1x8x8xbf16>
    %66 = vector.shape_cast %65 : vector<1x8x8xbf16> to vector<8x8xbf16>
    %67 = vector.shape_cast %64 : vector<8x8xbf16> to vector<1x8x8xbf16>
    tpu.vector_store %arg17[%c1_29, %c0_30, %c0_31], %67 {strides = array<i32>} : memref<4x8x8xbf16, #tpu.memory_space<vmem>>, vector<1x8x8xbf16>,
    %68 = vector.extract_strided_slice %37 {offsets = [0, 16], sizes = [8, 8], strides = [1, 1]} : vector<8x96xf32> to vector<8x8xf32>
    %69 = arith.truncf %68 : vector<8x8xf32> to vector<8x8xbf16>
    %c2 = arith.constant 2 : index
    %c0_32 = arith.constant 0 : index
    %c0_33 = arith.constant 0 : index
    %70 = vector.load %arg15[%c2, %c0_32, %c0_33] : memref<4x8x8xbf16, #tpu.memory_space<vmem>>, vector<1x8x8xbf16>
    %71 = vector.shape_cast %70 : vector<1x8x8xbf16> to vector<8x8xbf16>
    %72 = vector.shape_cast %69 : vector<8x8xbf16> to vector<1x8x8xbf16>
    tpu.vector_store %arg15[%c2, %c0_32, %c0_33], %72 {strides = array<i32>} : memref<4x8x8xbf16, #tpu.memory_space<vmem>>, vector<1x8x8xbf16>,
    %73 = vector.extract_strided_slice %37 {offsets = [0, 48], sizes = [8, 8], strides = [1, 1]} : vector<8x96xf32> to vector<8x8xf32>
    %74 = arith.truncf %73 : vector<8x8xf32> to vector<8x8xbf16>
    %c2_34 = arith.constant 2 : index
    %c0_35 = arith.constant 0 : index
    %c0_36 = arith.constant 0 : index
    %75 = vector.load %arg16[%c2_34, %c0_35, %c0_36] : memref<4x8x8xbf16, #tpu.memory_space<vmem>>, vector<1x8x8xbf16>
    %76 = vector.shape_cast %75 : vector<1x8x8xbf16> to vector<8x8xbf16>
    %77 = vector.shape_cast %74 : vector<8x8xbf16> to vector<1x8x8xbf16>
    tpu.vector_store %arg16[%c2_34, %c0_35, %c0_36], %77 {strides = array<i32>} : memref<4x8x8xbf16, #tpu.memory_space<vmem>>, vector<1x8x8xbf16>,
    %78 = vector.extract_strided_slice %37 {offsets = [0, 80], sizes = [8, 8], strides = [1, 1]} : vector<8x96xf32> to vector<8x8xf32>
    %79 = arith.truncf %78 : vector<8x8xf32> to vector<8x8xbf16>
    %c2_37 = arith.constant 2 : index
    %c0_38 = arith.constant 0 : index
    %c0_39 = arith.constant 0 : index
    %80 = vector.load %arg17[%c2_37, %c0_38, %c0_39] : memref<4x8x8xbf16, #tpu.memory_space<vmem>>, vector<1x8x8xbf16>
    %81 = vector.shape_cast %80 : vector<1x8x8xbf16> to vector<8x8xbf16>
    %82 = vector.shape_cast %79 : vector<8x8xbf16> to vector<1x8x8xbf16>
    tpu.vector_store %arg17[%c2_37, %c0_38, %c0_39], %82 {strides = array<i32>} : memref<4x8x8xbf16, #tpu.memory_space<vmem>>, vector<1x8x8xbf16>,
    %83 = vector.extract_strided_slice %37 {offsets = [0, 24], sizes = [8, 8], strides = [1, 1]} : vector<8x96xf32> to vector<8x8xf32>
    %84 = arith.truncf %83 : vector<8x8xf32> to vector<8x8xbf16>
    %c3 = arith.constant 3 : index
    %c0_40 = arith.constant 0 : index
    %c0_41 = arith.constant 0 : index
    %85 = vector.load %arg15[%c3, %c0_40, %c0_41] : memref<4x8x8xbf16, #tpu.memory_space<vmem>>, vector<1x8x8xbf16>
    %86 = vector.shape_cast %85 : vector<1x8x8xbf16> to vector<8x8xbf16>
    %87 = vector.shape_cast %84 : vector<8x8xbf16> to vector<1x8x8xbf16>
    tpu.vector_store %arg15[%c3, %c0_40, %c0_41], %87 {strides = array<i32>} : memref<4x8x8xbf16, #tpu.memory_space<vmem>>, vector<1x8x8xbf16>,
    %88 = vector.extract_strided_slice %37 {offsets = [0, 56], sizes = [8, 8], strides = [1, 1]} : vector<8x96xf32> to vector<8x8xf32>
    %89 = arith.truncf %88 : vector<8x8xf32> to vector<8x8xbf16>
    %c3_42 = arith.constant 3 : index
    %c0_43 = arith.constant 0 : index
    %c0_44 = arith.constant 0 : index
    %90 = vector.load %arg16[%c3_42, %c0_43, %c0_44] : memref<4x8x8xbf16, #tpu.memory_space<vmem>>, vector<1x8x8xbf16>
    %91 = vector.shape_cast %90 : vector<1x8x8xbf16> to vector<8x8xbf16>
    %92 = vector.shape_cast %89 : vector<8x8xbf16> to vector<1x8x8xbf16>
    tpu.vector_store %arg16[%c3_42, %c0_43, %c0_44], %92 {strides = array<i32>} : memref<4x8x8xbf16, #tpu.memory_space<vmem>>, vector<1x8x8xbf16>,
    %93 = vector.extract_strided_slice %37 {offsets = [0, 88], sizes = [8, 8], strides = [1, 1]} : vector<8x96xf32> to vector<8x8xf32>
    %94 = arith.truncf %93 : vector<8x8xf32> to vector<8x8xbf16>
    %c3_45 = arith.constant 3 : index
    %c0_46 = arith.constant 0 : index
    %c0_47 = arith.constant 0 : index
    %95 = vector.load %arg17[%c3_45, %c0_46, %c0_47] : memref<4x8x8xbf16, #tpu.memory_space<vmem>>, vector<1x8x8xbf16>
    %96 = vector.shape_cast %95 : vector<1x8x8xbf16> to vector<8x8xbf16>
    %97 = vector.shape_cast %94 : vector<8x8xbf16> to vector<1x8x8xbf16>
    tpu.vector_store %arg17[%c3_45, %c0_46, %c0_47], %97 {strides = array<i32>} : memref<4x8x8xbf16, #tpu.memory_space<vmem>>, vector<1x8x8xbf16>,
    %98 = tpu.iota {dimensions = array<i32: 0>} : vector<8x8xi32>
    %99 = tpu.iota {dimensions = array<i32: 1>} : vector<8x8xi32>
    %100 = arith.cmpi sgt, %99, %98 : vector<8x8xi32>
    %cst_48 = arith.constant -1.000000e+30 : f32
    %cst_49 = arith.constant 0.000000e+00 : f32
    %101 = vector.broadcast %cst_48 : f32 to vector<8x8xf32>
    %102 = vector.broadcast %cst_49 : f32 to vector<8x8xf32>
    %103 = arith.select %100, %101, %102 : vector<8x8xi1>, vector<8x8xf32>
    %c0_50 = arith.constant 0 : index
    %c0_51 = arith.constant 0 : index
    %c0_52 = arith.constant 0 : index
    %104 = vector.load %arg15[%c0_50, %c0_51, %c0_52] : memref<4x8x8xbf16, #tpu.memory_space<vmem>>, vector<4x8x8xbf16>
    %c0_53 = arith.constant 0 : index
    %c0_54 = arith.constant 0 : index
    %c0_55 = arith.constant 0 : index
    %105 = vector.load %arg16[%c0_53, %c0_54, %c0_55] : memref<4x8x8xbf16, #tpu.memory_space<vmem>>, vector<4x8x8xbf16>
    "tpu.trace_start"() <{level = 10 : i32, message = "nqd,nkd->nqk"}> : () -> ()
    %cst_56 = arith.constant dense<0.000000e+00> : vector<4x8x8xf32>
    %106 = tpu.matmul %104, %105, %cst_56 {dimension_numbers = #tpu.dot_dimension_numbers<[2], [2], [1], [1], [0, 0, 0, 1, 1, 1], [0], [0]>} : vector<4x8x8xbf16>, vector<4x8x8xbf16>, vector<4x8x8xf32> -> vector<4x8x8xf32>
    "tpu.trace_stop"() : () -> ()
    %cst_57 = arith.constant 0.353553385 : f32
    %107 = vector.broadcast %cst_57 : f32 to vector<4x8x8xf32>
    %108 = arith.mulf %106, %107 : vector<4x8x8xf32>
    %109 = vector.shape_cast %103 : vector<8x8xf32> to vector<1x8x8xf32>
    %110 = vector.broadcast %109 : vector<1x8x8xf32> to vector<4x8x8xf32>
    %111 = arith.addf %108, %110 : vector<4x8x8xf32>
    %cst_58 = arith.constant dense<0xFF800000> : vector<4x8xf32>
    %112 = vector.multi_reduction <maximumf>, %111, %cst_58 [2] : vector<4x8x8xf32> to vector<4x8xf32>
    %113 = vector.shape_cast %112 : vector<4x8xf32> to vector<4x8x1xf32>
    %114 = vector.broadcast %113 : vector<4x8x1xf32> to vector<4x8x8xf32>
    %115 = arith.subf %111, %114 : vector<4x8x8xf32>
    %116 = math.exp %115 : vector<4x8x8xf32>
    %cst_59 = arith.constant dense<0.000000e+00> : vector<4x8xf32>
    %117 = vector.multi_reduction <add>, %116, %cst_59 [2] : vector<4x8x8xf32> to vector<4x8xf32>
    %118 = vector.shape_cast %117 : vector<4x8xf32> to vector<4x8x1xf32>
    %119 = tpu.reciprocal %118 {approx = true} : vector<4x8x1xf32> -> vector<4x8x1xf32>
    %120 = vector.broadcast %119 : vector<4x8x1xf32> to vector<4x8x8xf32>
    %121 = arith.mulf %116, %120 : vector<4x8x8xf32>
    %122 = arith.truncf %121 : vector<4x8x8xf32> to vector<4x8x8xbf16>
    %c0_60 = arith.constant 0 : index
    %c0_61 = arith.constant 0 : index
    %c0_62 = arith.constant 0 : index
    %123 = vector.load %arg17[%c0_60, %c0_61, %c0_62] : memref<4x8x8xbf16, #tpu.memory_space<vmem>>, vector<4x8x8xbf16>
    "tpu.trace_start"() <{level = 10 : i32, message = "nqk,nkd->nqd"}> : () -> ()
    %cst_63 = arith.constant dense<0.000000e+00> : vector<4x8x8xf32>
    %124 = tpu.matmul %122, %123, %cst_63 {dimension_numbers = #tpu.dot_dimension_numbers<[2], [1], [1], [2], [0, 0, 0, 1, 1, 2], [0], [0]>} : vector<4x8x8xbf16>, vector<4x8x8xbf16>, vector<4x8x8xf32> -> vector<4x8x8xf32>
    "tpu.trace_stop"() : () -> ()
    %125 = vector.extract_strided_slice %124 {offsets = [0, 0, 0], sizes = [1, 8, 8], strides = [1, 1, 1]} : vector<4x8x8xf32> to vector<1x8x8xf32>
    %126 = vector.shape_cast %125 : vector<1x8x8xf32> to vector<8x8xf32>
    %127 = arith.truncf %126 : vector<8x8xf32> to vector<8x8xbf16>
    %c0_64 = arith.constant 0 : index
    %c0_65 = arith.constant 0 : index
    %128 = vector.load %arg18[%c0_64, %c0_65] : memref<8x32xbf16, #tpu.memory_space<vmem>>, vector<8x8xbf16>
    tpu.vector_store %arg18[%c0_64, %c0_65], %127 {strides = array<i32>} : memref<8x32xbf16, #tpu.memory_space<vmem>>, vector<8x8xbf16>,
    %129 = vector.extract_strided_slice %124 {offsets = [1, 0, 0], sizes = [1, 8, 8], strides = [1, 1, 1]} : vector<4x8x8xf32> to vector<1x8x8xf32>
    %130 = vector.shape_cast %129 : vector<1x8x8xf32> to vector<8x8xf32>
    %131 = arith.truncf %130 : vector<8x8xf32> to vector<8x8xbf16>
    %c0_66 = arith.constant 0 : index
    %c8 = arith.constant 8 : index
    %132 = vector.load %arg18[%c0_66, %c8] : memref<8x32xbf16, #tpu.memory_space<vmem>>, vector<8x8xbf16>
    tpu.vector_store %arg18[%c0_66, %c8], %131 {strides = array<i32>} : memref<8x32xbf16, #tpu.memory_space<vmem>>, vector<8x8xbf16>,
    %133 = vector.extract_strided_slice %124 {offsets = [2, 0, 0], sizes = [1, 8, 8], strides = [1, 1, 1]} : vector<4x8x8xf32> to vector<1x8x8xf32>
    %134 = vector.shape_cast %133 : vector<1x8x8xf32> to vector<8x8xf32>
    %135 = arith.truncf %134 : vector<8x8xf32> to vector<8x8xbf16>
    %c0_67 = arith.constant 0 : index
    %c16 = arith.constant 16 : index
    %136 = vector.load %arg18[%c0_67, %c16] : memref<8x32xbf16, #tpu.memory_space<vmem>>, vector<8x8xbf16>
    tpu.vector_store %arg18[%c0_67, %c16], %135 {strides = array<i32>} : memref<8x32xbf16, #tpu.memory_space<vmem>>, vector<8x8xbf16>,
    %137 = vector.extract_strided_slice %124 {offsets = [3, 0, 0], sizes = [1, 8, 8], strides = [1, 1, 1]} : vector<4x8x8xf32> to vector<1x8x8xf32>
    %138 = vector.shape_cast %137 : vector<1x8x8xf32> to vector<8x8xf32>
    %139 = arith.truncf %138 : vector<8x8xf32> to vector<8x8xbf16>
    %c0_68 = arith.constant 0 : index
    %c24 = arith.constant 24 : index
    %140 = vector.load %arg18[%c0_68, %c24] : memref<8x32xbf16, #tpu.memory_space<vmem>>, vector<8x8xbf16>
    tpu.vector_store %arg18[%c0_68, %c24], %139 {strides = array<i32>} : memref<8x32xbf16, #tpu.memory_space<vmem>>, vector<8x8xbf16>,
    %c0_69 = arith.constant 0 : index
    %c0_70 = arith.constant 0 : index
    %141 = vector.load %arg18[%c0_69, %c0_70] : memref<8x32xbf16, #tpu.memory_space<vmem>>, vector<8x32xbf16>
    %c0_71 = arith.constant 0 : index
    %c0_72 = arith.constant 0 : index
    %142 = vector.load %arg6[%c0_71, %c0_72] : memref<32x32xbf16, #tpu.memory_space<vmem>>, vector<32x32xbf16>
    %cst_73 = arith.constant dense<0.000000e+00> : vector<8x32xf32>
    %143 = tpu.matmul %141, %142, %cst_73 {dimension_numbers = #tpu.dot_dimension_numbers<[1], [0], [0], [1], [0, 0, 1, 1], [], []>} : vector<8x32xbf16>, vector<32x32xbf16>, vector<8x32xf32> -> vector<8x32xf32>
    %c0_74 = arith.constant 0 : index
    %c0_75 = arith.constant 0 : index
    %144 = vector.load %arg7[%c0_74, %c0_75] : memref<1x32xf32, #tpu.memory_space<vmem>>, vector<1x32xf32>
    %145 = vector.shape_cast %144 : vector<1x32xf32> to vector<32xf32>
    %146 = vector.shape_cast %145 : vector<32xf32> to vector<1x32xf32>
    %147 = vector.broadcast %146 : vector<1x32xf32> to vector<8x32xf32>
    %148 = arith.addf %143, %147 : vector<8x32xf32>
    %149 = arith.addf %1, %148 : vector<8x32xf32>
    %cst_76 = arith.constant dense<0.000000e+00> : vector<8xf32>
    %150 = vector.multi_reduction <add>, %149, %cst_76 [1] : vector<8x32xf32> to vector<8xf32>
    %151 = vector.shape_cast %150 : vector<8xf32> to vector<8x1xf32>
    %cst_77 = arith.constant 3.200000e+01 : f32
    %152 = vector.broadcast %cst_77 : f32 to vector<8x1xf32>
    %153 = arith.divf %151, %152 : vector<8x1xf32>
    %154 = vector.broadcast %153 : vector<8x1xf32> to vector<8x32xf32>
    %155 = arith.subf %149, %154 : vector<8x32xf32>
    %156 = arith.mulf %155, %155 : vector<8x32xf32>
    %cst_78 = arith.constant dense<0.000000e+00> : vector<8xf32>
    %157 = vector.multi_reduction <add>, %156, %cst_78 [1] : vector<8x32xf32> to vector<8xf32>
    %158 = vector.shape_cast %157 : vector<8xf32> to vector<8x1xf32>
    %cst_79 = arith.constant 3.200000e+01 : f32
    %159 = vector.broadcast %cst_79 : f32 to vector<8x1xf32>
    %160 = arith.divf %158, %159 : vector<8x1xf32>
    %161 = vector.broadcast %153 : vector<8x1xf32> to vector<8x32xf32>
    %162 = arith.subf %149, %161 : vector<8x32xf32>
    %cst_80 = arith.constant 9.99999974E-6 : f32
    %163 = vector.broadcast %cst_80 : f32 to vector<8x1xf32>
    %164 = arith.addf %160, %163 : vector<8x1xf32>
    %165 = math.rsqrt %164 : vector<8x1xf32>
    %166 = vector.broadcast %165 : vector<8x1xf32> to vector<8x32xf32>
    %167 = arith.mulf %162, %166 : vector<8x32xf32>
    %c0_81 = arith.constant 0 : index
    %c0_82 = arith.constant 0 : index
    %168 = vector.load %arg8[%c0_81, %c0_82] : memref<1x32xf32, #tpu.memory_space<vmem>>, vector<1x32xf32>
    %169 = vector.shape_cast %168 : vector<1x32xf32> to vector<32xf32>
    %170 = vector.shape_cast %169 : vector<32xf32> to vector<1x32xf32>
    %171 = vector.broadcast %170 : vector<1x32xf32> to vector<8x32xf32>
    %172 = arith.mulf %167, %171 : vector<8x32xf32>
    %c0_83 = arith.constant 0 : index
    %c0_84 = arith.constant 0 : index
    %173 = vector.load %arg9[%c0_83, %c0_84] : memref<1x32xf32, #tpu.memory_space<vmem>>, vector<1x32xf32>
    %174 = vector.shape_cast %173 : vector<1x32xf32> to vector<32xf32>
    %175 = vector.shape_cast %174 : vector<32xf32> to vector<1x32xf32>
    %176 = vector.broadcast %175 : vector<1x32xf32> to vector<8x32xf32>
    %177 = arith.addf %172, %176 : vector<8x32xf32>
    %178 = arith.truncf %177 : vector<8x32xf32> to vector<8x32xbf16>
    %c0_85 = arith.constant 0 : index
    %c0_86 = arith.constant 0 : index
    %179 = vector.load %arg10[%c0_85, %c0_86] : memref<32x128xbf16, #tpu.memory_space<vmem>>, vector<32x128xbf16>
    %cst_87 = arith.constant dense<0.000000e+00> : vector<8x128xf32>
    %180 = tpu.matmul %178, %179, %cst_87 {dimension_numbers = #tpu.dot_dimension_numbers<[1], [0], [0], [1], [0, 0, 1, 1], [], []>} : vector<8x32xbf16>, vector<32x128xbf16>, vector<8x128xf32> -> vector<8x128xf32>
    %c0_88 = arith.constant 0 : index
    %c0_89 = arith.constant 0 : index
    %181 = vector.load %arg11[%c0_88, %c0_89] : memref<1x128xf32, #tpu.memory_space<vmem>>, vector<1x128xf32>
    %182 = vector.shape_cast %181 : vector<1x128xf32> to vector<128xf32>
    %183 = vector.shape_cast %182 : vector<128xf32> to vector<1x128xf32>
    %184 = vector.broadcast %183 : vector<1x128xf32> to vector<8x128xf32>
    %185 = arith.addf %180, %184 : vector<8x128xf32>
    %cst_90 = arith.constant 5.000000e-01 : f32
    %186 = vector.broadcast %cst_90 : f32 to vector<8x128xf32>
    %187 = arith.mulf %186, %185 : vector<8x128xf32>
    %cst_91 = arith.constant 0.707106769 : f32
    %188 = vector.broadcast %cst_91 : f32 to vector<8x128xf32>
    %189 = arith.mulf %185, %188 : vector<8x128xf32>
    %190 = math.erf %189 : vector<8x128xf32>
    %cst_92 = arith.constant 1.000000e+00 : f32
    %191 = vector.broadcast %cst_92 : f32 to vector<8x128xf32>
    %192 = arith.addf %191, %190 : vector<8x128xf32>
    %193 = arith.mulf %187, %192 : vector<8x128xf32>
    %194 = arith.truncf %193 : vector<8x128xf32> to vector<8x128xbf16>
    %c0_93 = arith.constant 0 : index
    %c0_94 = arith.constant 0 : index
    %195 = vector.load %arg12[%c0_93, %c0_94] : memref<128x32xbf16, #tpu.memory_space<vmem>>, vector<128x32xbf16>
    %cst_95 = arith.constant dense<0.000000e+00> : vector<8x32xf32>
    %196 = tpu.matmul %194, %195, %cst_95 {dimension_numbers = #tpu.dot_dimension_numbers<[1], [0], [0], [1], [0, 0, 1, 1], [], []>} : vector<8x128xbf16>, vector<128x32xbf16>, vector<8x32xf32> -> vector<8x32xf32>
    %c0_96 = arith.constant 0 : index
    %c0_97 = arith.constant 0 : index
    %197 = vector.load %arg13[%c0_96, %c0_97] : memref<1x32xf32, #tpu.memory_space<vmem>>, vector<1x32xf32>
    %198 = vector.shape_cast %197 : vector<1x32xf32> to vector<32xf32>
    %199 = vector.shape_cast %198 : vector<32xf32> to vector<1x32xf32>
    %200 = vector.broadcast %199 : vector<1x32xf32> to vector<8x32xf32>
    %201 = arith.addf %196, %200 : vector<8x32xf32>
    %202 = arith.addf %149, %201 : vector<8x32xf32>
    %c0_98 = arith.constant 0 : index
    %c0_99 = arith.constant 0 : index
    %c0_100 = arith.constant 0 : index
    %203 = vector.load %arg14[%c0_98, %c0_99, %c0_100] : memref<1x8x32xf32, #tpu.memory_space<vmem>>, vector<1x8x32xf32>
    %204 = vector.shape_cast %203 : vector<1x8x32xf32> to vector<8x32xf32>
    %205 = vector.shape_cast %202 : vector<8x32xf32> to vector<1x8x32xf32>
    tpu.vector_store %arg14[%c0_98, %c0_99, %c0_100], %205 {strides = array<i32>} : memref<1x8x32xf32, #tpu.memory_space<vmem>>, vector<1x8x32xf32>,
    return
  }
  func.func @transform_0(%arg0: i32) -> (i32, i32, i32) {
    %c0_i32 = arith.constant 0 : i32
    %c0_i32_0 = arith.constant 0 : i32
    %c0_i32_1 = arith.constant 0 : i32
    return %arg0, %c0_i32, %c0_i32_0 : i32, i32, i32
  }
  func.func @transform_1(%arg0: i32) -> (i32, i32) {
    %c0_i32 = arith.constant 0 : i32
    %c0_i32_0 = arith.constant 0 : i32
    %c0_i32_1 = arith.constant 0 : i32
    return %c0_i32, %c0_i32_0 : i32, i32
  }
  func.func @transform_2(%arg0: i32) -> (i32, i32) {
    %c0_i32 = arith.constant 0 : i32
    %c0_i32_0 = arith.constant 0 : i32
    %c0_i32_1 = arith.constant 0 : i32
    return %c0_i32, %c0_i32_0 : i32, i32
  }
  func.func @transform_3(%arg0: i32) -> (i32, i32) {
    %c0_i32 = arith.constant 0 : i32
    %c0_i32_0 = arith.constant 0 : i32
    %c0_i32_1 = arith.constant 0 : i32
    return %c0_i32, %c0_i32_0 : i32, i32
  }
  func.func @transform_4(%arg0: i32) -> (i32, i32) {
    %c0_i32 = arith.constant 0 : i32
    %c0_i32_0 = arith.constant 0 : i32
    %c0_i32_1 = arith.constant 0 : i32
    return %c0_i32, %c0_i32_0 : i32, i32
  }
  func.func @transform_5(%arg0: i32) -> (i32, i32) {
    %c0_i32 = arith.constant 0 : i32
    %c0_i32_0 = arith.constant 0 : i32
    %c0_i32_1 = arith.constant 0 : i32
    return %c0_i32, %c0_i32_0 : i32, i32
  }
  func.func @transform_6(%arg0: i32) -> (i32, i32) {
    %c0_i32 = arith.constant 0 : i32
    %c0_i32_0 = arith.constant 0 : i32
    %c0_i32_1 = arith.constant 0 : i32
    return %c0_i32, %c0_i32_0 : i32, i32
  }
  func.func @transform_7(%arg0: i32) -> (i32, i32) {
    %c0_i32 = arith.constant 0 : i32
    %c0_i32_0 = arith.constant 0 : i32
    %c0_i32_1 = arith.constant 0 : i32
    return %c0_i32, %c0_i32_0 : i32, i32
  }
  func.func @transform_8(%arg0: i32) -> (i32, i32) {
    %c0_i32 = arith.constant 0 : i32
    %c0_i32_0 = arith.constant 0 : i32
    %c0_i32_1 = arith.constant 0 : i32
    return %c0_i32, %c0_i32_0 : i32, i32
  }
  func.func @transform_9(%arg0: i32) -> (i32, i32) {
    %c0_i32 = arith.constant 0 : i32
    %c0_i32_0 = arith.constant 0 : i32
    %c0_i32_1 = arith.constant 0 : i32
    return %c0_i32, %c0_i32_0 : i32, i32
  }
  func.func @transform_10(%arg0: i32) -> (i32, i32) {
    %c0_i32 = arith.constant 0 : i32
    %c0_i32_0 = arith.constant 0 : i32
    %c0_i32_1 = arith.constant 0 : i32
    return %c0_i32, %c0_i32_0 : i32, i32
  }
  func.func @transform_11(%arg0: i32) -> (i32, i32) {
    %c0_i32 = arith.constant 0 : i32
    %c0_i32_0 = arith.constant 0 : i32
    %c0_i32_1 = arith.constant 0 : i32
    return %c0_i32, %c0_i32_0 : i32, i32
  }
  func.func @transform_12(%arg0: i32) -> (i32, i32) {
    %c0_i32 = arith.constant 0 : i32
    %c0_i32_0 = arith.constant 0 : i32
    %c0_i32_1 = arith.constant 0 : i32
    return %c0_i32, %c0_i32_0 : i32, i32
  }
  func.func @transform_13(%arg0: i32) -> (i32, i32, i32) {
    %c0_i32 = arith.constant 0 : i32
    %c0_i32_0 = arith.constant 0 : i32
    %c0_i32_1 = arith.constant 0 : i32
    return %arg0, %c0_i32, %c0_i32_0 : i32, i32, i32
  }
}

</mosaic_0001>

<bundles_post_ra>
// kernel: tpu_custom_call.1
= control target key start
LH: loop header
LB: loop body
LE: loop exit
PB: predicated region body
PF: predicated region fallthrough
CT: control target
= control target key end

     0   :  { %s2122_s0 = inlined_call_operand.vmem [shape: f32[2,8,32], index: 0, kind: input, shape index: {}]   ;;  %s2123_s1 = inlined_call_operand.vmem [shape: f32[1,32], index: 1, kind: input, shape index: {}]   ;;  %s2124_s2 = inlined_call_operand.vmem [shape: f32[1,32], index: 2, kind: input, shape index: {}]   ;;  %s2125_s3 = inlined_call_operand.vmem [shape: bf16[32,96], index: 3, kind: input, shape index: {}]   ;;  %s2126_s4 = inlined_call_operand.vmem [shape: f32[1,96], index: 4, kind: input, shape index: {}]   ;;  %s2127_s5 = inlined_call_operand.vmem [shape: bf16[32,32], index: 5, kind: input, shape index: {}]   ;;  %s2128_s6 = inlined_call_operand.vmem [shape: f32[1,32], index: 6, kind: input, shape index: {}]   ;;  %s2129_s7 = inlined_call_operand.vmem [shape: f32[1,32], index: 7, kind: input, shape index: {}]   ;;  %s2130_s8 = inlined_call_operand.vmem [shape: f32[1,32], index: 8, kind: input, shape index: {}]   ;;  %s2131_s9 = inlined_call_operand.vmem [shape: bf16[32,128], index: 9, kind: input, shape index: {}]   ;;  %s2132_s10 = inlined_call_operand.vmem [shape: f32[1,128], index: 10, kind: input, shape index: {}]   ;;  %s2133_s11 = inlined_call_operand.vmem [shape: bf16[128,32], index: 11, kind: input, shape index: {}]   ;;  %s2134_s12 = inlined_call_operand.vmem [shape: f32[1,32], index: 12, kind: input, shape index: {}]   ;;  %s2135_s13 = inlined_call_operand.hbm [shape: f32[2,8,32], index: 13, kind: output, shape index: {}]  }
   0x1   :  { %2136 = sst [smem:[#allocation9_spill]] %s2122_s0 }
   0x2   :  { %2137 = sst [smem:[#allocation10_spill]] %s2123_s1 }
   0x3   :  { %2138 = sst [smem:[#allocation11_spill]] %s2124_s2 }
   0x4   :  { %18 = vsyncpa [#allocation7], 0 }
   0x5   :  { %20 = vsyncpa [#allocation7 + $0x1], 0  ;;  %s1841_s25 = smov 0   ;;  %s1843_s26 = smov 0  }
   0x6   :  { %s1845_s27 = smov 0   ;;  %s1847_s28 = smov 0  }
   0x7 LB: > { %s1862_s29 = sadd.s32 4294967295, %s1752_s28   ;;  %s1424_s30 = sadd.s32 4294967294, %s1752_s28   ;;  %s1752_s28 = sphi %s1847_s28, %s2147_s28   ;;  %s1748_s27 = sphi %s1845_s27, %s2146_s27   ;;  %s1744_s26 = sphi %s1843_s26, %s2145_s26   ;;  %s1740_s25 = sphi %s1841_s25, %s2144_s25  }
   0x8   : > { %s1866_s14 = sadd.s32 1, %s1752_s28   ;;  %s311_s15 = sadd.s32 1, %s1748_s27 }
   0x9   : > { %s308_s16 = ssub.s32 %s1752_s28, %s1866_s14  ;;  %p321_p0 = scmp.ne.s32.totalorder %s1748_s27, %s1744_s26 }
   0xa   : > { %p309_p1 = scmp.eq.s32.totalorder %s308_s16, 0  ;;  %p322_p2 = scmp.eq.s32.totalorder %s1862_s29, 1 }
   0xb   : > { %p327_p3 = scmp.ne.s32.totalorder %s1744_s26, %s1740_s25  ;;  %p328_p4 = scmp.eq.s32.totalorder %s1424_s30, 1 }
   0xc   : > { %s1877_s17 = scalar_select %p309_p1, %s1748_s27, %s311_s15  }
   0xd   : > { %p1879_p5 = por %p322_p2, %p321_p0  ;;  %p1883_p6 = por %p328_p4, %p327_p3 }
   0xe   : > { %p1427_p7 = scmp.ge.s32.totalorder %s1752_s28, 1  ;;  %p389_p8 = scmp.lt.s32.totalorder %s1752_s28, 3 }
  0x10   : > { %p390_p9 = pnand %p1427_p7, %p389_p8 }
  0x11   : > { %p432_p10 = scmp.lt.s32.totalorder (!%p390_p9), %s1862_s29, 1  ;;  %s2141_s0 = sld [smem:[#allocation9_spill]] (!%p390_p9) }
  0x12   : > { %393 = sbr.rel (%p390_p9) target bundleno = 2452 (0x994), region = 72  ;;  %s2142_s1 = sld [smem:[#allocation10_spill]] (!%p390_p9) }
  0x13   : > { %s2143_s2 = sld [smem:[#allocation11_spill]] (!%p390_p9)  ;;  %s1756_s16 = smov (!%p390_p9), 80  }
  0x14   : > { %s1759_s22 = smov (!%p390_p9), 120   ;;  %s1760_s23 = smov (!%p390_p9), 72  }
  0x15   : > { %s1762_s30 = smov (!%p390_p9), 104   ;;  %s1763_s15 = smov (!%p390_p9), 64  }
  0x17   : > { %s433_s20 = scalar_select %p432_p10, %s1862_s29, 1  ;;  %vm438_vm0 = vcmask 261120   ;;  %v1656_v7 = vld [vmem:[%s2125_s3 + $0x8] sm:$0xff]   ;;  %v1754_v8 = vmov 0.0   ;;  %vm1755_vm1 = vmmov 0   ;;  %v1657_v9 = vld [vmem:[%s2125_s3] sm:$0xff]   ;;  %v595_v46 = vlaneseq }
  0x18   : > { %1509 = vmatprep.subr.bf16.mxu0 %v1754_v8  ;;  %1513 = vmatprep.mubr.msk.bf16.mxu0 %vm1755_vm1, %v1754_v8  ;;  %v1430_v14 = vld [vmem:[%s2142_s1] ss:$0 sm:$0xff]  ;;  %vm537_vm2 = vcmask 60416   ;;  %vm609_vm3 = vcmask 64512   ;;  %vm857_vm5 = vcmask 1043456   ;;  %vm1048_vm6 = vcmask 126016  }
  0x19   : > { %s1429_s21 = sshll.u32 %s433_s20, 3  ;;  %1510 = vmatpush3.bf16.msra.mxu0 %v1656_v7  ;;  %1529 = vmatprep.subr.bf16.mxu1 %v1754_v8  ;;  %v1431_v16 = vld [vmem:[%s2143_s2] ss:$0 sm:$0xff]  ;;  %s1757_s20 = smov 96   ;;  %v596_v47 = vshrl.u32 %v595_v46, 7  ;;  %v598_v48 = vand.u32 127, %v595_v46 }
  0x1a   : > { %s435_s24 = scalar_lea.vmem %s2141_s0, %s1429_s21  ;;  %1511 = vmatprep.subr.bf16.mxu0 %v1754_v8  ;;  %1531 = vmatprep.mubr.msk.bf16.mxu1 %vm1755_vm1, %v1754_v8  ;;  %v1432_v20 = vld [vmem:[%s2126_s4] ss:$0 sm:$0xff]  ;;  %s1758_s21 = smov 88   ;;  %vm1057_vm7 = vcmask 191616   ;;  %vm1066_vm8 = vcmask 257216  }
  0x1b   : > { %v1894_v0 = vld [vmem:[%s435_s24] sm:$0xff]  ;;  %s1761_s24 = smov 112   ;;  %vm599_vm4 = vcmp.gt.s32.totalorder %v598_v48, %v596_v47 }
  0x1c   : > { %v439_v1 = vsel %vm438_vm0, %v1894_v0, 0.0  ;;  %v600_v50 = vsel %vm599_vm4, -1e+30, %v1754_v8 }
  0x1d   : > { %440 = vadd.xlane.f32.xlu0 %v439_v1  ;;  %1512 = vmatpush3.bf16.msra.mxu0 %v1657_v9 }
  0x1e   : > { %1517 = vmatprep.subr.bf16.mxu0 %v1754_v8 }
  0xa6   : > { %v441_v2 = vpop.xlane.xlu0 %440 }
  0xa7   : > { %v443_v3 = vmul.f32 0.03125, %v441_v2 }
  0xa9   : > { %v444_v4 = vsub.f32 %v1894_v0, %v443_v3 }
  0xab   : > { %v445_v5 = vmul.f32 %v444_v4, %v444_v4 }
  0xad   : > { %v446_v6 = vsel %vm438_vm0, %v445_v5, 0.0 }
  0xae   : > { %447 = vadd.xlane.f32.xlu0 %v446_v6 }
 0x137   : > { %v448_v10 = vpop.xlane.xlu0 %447 }
 0x138   : > { %v449_v11 = vmul.f32 0.03125, %v448_v10 }
 0x13a   : > { %v450_v12 = vadd.f32 1e-05, %v449_v11 }
 0x13c   : > { %1670 = vrsqrt.f32 %v450_v12 }
 0x149   : > { %v1671_v13 = vpop.eup %1670 }
 0x14a   : > { %v452_v15 = vmul.f32 %v1671_v13, %v444_v4 }
 0x14c   : > { %v460_v17 = vmul.f32 %v1430_v14, %v452_v15 }
 0x14e   : > { %v468_v18 = vadd.f32 %v1431_v16, %v460_v17 }
 0x150   : > { %v469_v19 = vpack.c.bf16 %v468_v18, %v468_v18 }
 0x152   : > { %1514 = vmatmul.mubr.msk.bf16.vlgmr.msra.gmra.mxu0 %vm438_vm0, %v469_v19 }
 0x153   : > { %1519 = vmatprep.mubr.msk.bf16.mxu0 %vm1755_vm1, %v1754_v8 }
 0x212   : > { %v530_v21 = vpop.f32.mrf.mxu0 }
 0x213   : > { %v531_v22 = vadd.f32 %v1432_v20, %v530_v21 }
 0x214   : > { %v1515_v23 = vpop.f32.mrf.mxu0 }
 0x215   : > { %v1926_v24 = vpack.c.bf16 %v531_v22, %v531_v22 }
 0x216   : > { %v533_v25 = vpop.f32.mrf.mxu0 }
 0x217   : > { %570 = vrot.lane.b32.xlu0 %v1926_v24, %s1756_s16  ;;  %542 = vrot.lane.b32.xlu1 %v1926_v24, %s1757_s20  ;;  %538 = vst.msk [vmem:[#allocation2] sm:$0xf] %vm537_vm2, %v1926_v24  ;;  %s1764_s16 = smov 48   ;;  %s1765_s20 = smov 40  }
 0x218   : > { %v1516_v26 = vpop.f32.mrf.mxu0 }
 0x21b   : > { %555 = vrot.lane.b32.xlu1 %v1926_v24, %s1758_s21  ;;  %s1766_s21 = smov 56  }
 0x21e   : > { %v601_v38 = vld [vmem:[#allocation2] sm:$0xf] }
 0x21f   : > { %550 = vrot.lane.b32.xlu1 %v1926_v24, %s1759_s22  ;;  %s1767_s22 = smov 16  }
 0x223   : > { %585 = vrot.lane.b32.xlu1 %v1926_v24, %s1760_s23 }
 0x227   : > { %565 = vrot.lane.b32.xlu1 %v1926_v24, %s1761_s24 }
 0x22b   : > { %580 = vrot.lane.b32.xlu1 %v1926_v24, %s1762_s30  ;;  %s429_s30 = sand.u32 1, %s1744_s26  }
 0x289   : > { %v571_v27 = vpop.permute.xlu0 %570  ;;  %v543_v28 = vpop.permute.xlu1 %542 }
 0x28a   : > { %574 = vst.msk [vmem:[#allocation3 + $0x8] sm:$0xf] %vm537_vm2, %v571_v27  ;;  %545 = vst.msk [vmem:[#allocation3] sm:$0xf] %vm537_vm2, %v543_v28 }
 0x28d   : > { %v556_v29 = vpop.permute.xlu1 %555 }
 0x28e   : > { %559 = vst.msk [vmem:[#allocation3 + $0x4] sm:$0xf] %vm537_vm2, %v556_v29 }
 0x291   : > { %v551_v30 = vpop.permute.xlu1 %550  ;;  %v605_v31 = vld [vmem:[#allocation3] sm:$0xf]  ;;  %v607_v32 = vld [vmem:[#allocation3 + $0x8] sm:$0xf] }
 0x292   : > { %554 = vst.msk [vmem:[#allocation2 + $0x4] sm:$0xf] %vm537_vm2, %v551_v30  ;;  %v614_v33 = vsel %vm609_vm3, %v605_v31, 0  ;;  %v706_v34 = vsel %vm609_vm3, %v607_v32, 0 }
 0x293   : > { %1518 = vmatpush3.bf16.xpose.msra.mxu0 %v614_v33  ;;  %1530 = vmatpush3.bf16.xpose.msra.mxu1 %v706_v34 }
 0x294   : > { %1523 = vmatprep.subr.bf16.mxu0 %v1754_v8  ;;  %1541 = vmatprep.subr.bf16.mxu1 %v1754_v8 }
 0x295   : > { %v586_v35 = vpop.permute.xlu1 %585  ;;  %v606_v36 = vld [vmem:[#allocation3 + $0x4] sm:$0xf] }
 0x296   : > { %589 = vst.msk [vmem:[#allocation3 + $0xc] sm:$0xf] %vm537_vm2, %v586_v35  ;;  %v660_v39 = vsel %vm609_vm3, %v606_v36, 0 }
 0x299   : > { %v566_v37 = vpop.permute.xlu1 %565  ;;  %v602_v42 = vld [vmem:[#allocation2 + $0x4] sm:$0xf] }
 0x29a   : > { %569 = vst.msk [vmem:[#allocation2 + $0x8] sm:$0xf] %vm537_vm2, %v566_v37  ;;  %1520 = vmatmul.mubr.msk.bf16.vlgmr.msra.gmra.mxu0 %vm609_vm3, %v601_v38 }
 0x29b   : > { %1524 = vmatpush3.bf16.xpose.msra.mxu0 %v660_v39  ;;  %1525 = vmatprep.mubr.msk.bf16.mxu0 %vm1755_vm1, %v1754_v8 }
 0x29c   : > { %1535 = vmatprep.subr.bf16.mxu0 %v1754_v8 }
 0x29d   : > { %v581_v40 = vpop.permute.xlu1 %580  ;;  %v608_v41 = vld [vmem:[#allocation3 + $0xc] sm:$0xf] }
 0x29e   : > { %584 = vst.msk [vmem:[#allocation2 + $0xc] sm:$0xf] %vm537_vm2, %v581_v40  ;;  %v752_v44 = vsel %vm609_vm3, %v608_v41, 0 }
 0x2a1   : > { %v603_v43 = vld [vmem:[#allocation2 + $0x8] sm:$0xf] }
 0x2a2   : > { %1526 = vmatmul.mubr.msk.bf16.vlgmr.msra.gmra.mxu0 %vm609_vm3, %v602_v42  ;;  %1532 = vmatmul.mubr.msk.bf16.vlgmr.msra.gmra.mxu1 %vm609_vm3, %v603_v43 }
 0x2a3   : > { %1536 = vmatpush3.bf16.xpose.msra.mxu0 %v752_v44  ;;  %1537 = vmatprep.mubr.msk.bf16.mxu0 %vm1755_vm1, %v1754_v8 }
 0x2a4   : > { %1543 = vmatprep.mubr.msk.bf16.mxu1 %vm1755_vm1, %v1754_v8  ;;  %1547 = vmatprep.subr.bf16.mxu0 %v1754_v8 }
 0x2a5   : > { %v604_v45 = vld [vmem:[#allocation2 + $0xc] sm:$0xf] }
 0x2aa   : > { %1538 = vmatmul.mubr.msk.bf16.vlgmr.msra.gmra.mxu0 %vm609_vm3, %v604_v45 }
 0x2ab   : > { %1549 = vmatprep.mubr.msk.bf16.mxu0 %vm1755_vm1, %v1754_v8 }
 0x35a   : > { %v650_v49 = vpop.f32.mrf.mxu0 }
 0x35b   : > { %v794_v51 = vmul.f32 0.35355338, %v650_v49 }
 0x35c   : > { %v1521_v52 = vpop.f32.mrf.mxu0 }
 0x35d   : > { %v798_v53 = vadd.f32 %v794_v51, %v600_v50 }
 0x35e   : > { %v653_v54 = vpop.f32.mrf.mxu0 }
 0x35f   : > { %v802_v55 = vsel %vm609_vm3, %v798_v53, -inf }
 0x360   : > { %803 = vmax.xlane.f32.xlu1 %v802_v55  ;;  %v1522_v56 = vpop.f32.mrf.mxu0 }
 0x362   : > { %v696_v57 = vpop.f32.mrf.mxu0  ;;  %v742_v58 = vpop.f32.mrf.mxu1 }
 0x363   : > { %v795_v59 = vmul.f32 0.35355338, %v696_v57  ;;  %v796_v60 = vmul.f32 0.35355338, %v742_v58 }
 0x364   : > { %v1527_v61 = vpop.f32.mrf.mxu0  ;;  %v1533_v62 = vpop.f32.mrf.mxu1 }
 0x365   : > { %v800_v63 = vadd.f32 %v796_v60, %v600_v50  ;;  %v799_v1 = vadd.f32 %v795_v59, %v600_v50 }
 0x366   : > { %v699_v2 = vpop.f32.mrf.mxu0  ;;  %v745_v3 = vpop.f32.mrf.mxu1 }
 0x367   : > { %v808_v4 = vsel %vm609_vm3, %v800_v63, -inf  ;;  %v805_v5 = vsel %vm609_vm3, %v799_v1, -inf }
 0x368   : > { %v1534_v6 = vpop.f32.mrf.mxu1  ;;  %809 = vmax.xlane.f32.xlu1 %v808_v4  ;;  %806 = vmax.xlane.f32.xlu0 %v805_v5  ;;  %v1528_v7 = vpop.f32.mrf.mxu0 }
 0x36a   : > { %v788_v9 = vpop.f32.mrf.mxu0 }
 0x36b   : > { %v797_v10 = vmul.f32 0.35355338, %v788_v9 }
 0x36c   : > { %v1539_v11 = vpop.f32.mrf.mxu0 }
 0x36d   : > { %v801_v12 = vadd.f32 %v797_v10, %v600_v50  ;;  %v1658_v11 = vld [vmem:[%s2127_s5 + $0x8] sm:$0xff]  }
 0x36e   : > { %v791_v13 = vpop.f32.mrf.mxu0 }
 0x36f   : > { %v811_v14 = vsel %vm609_vm3, %v801_v12, -inf }
 0x370   : > { %812 = vmax.xlane.f32.xlu0 %v811_v14  ;;  %v1540_v15 = vpop.f32.mrf.mxu0  ;;  %v1659_v14 = vld [vmem:[%s2127_s5] sm:$0xff]  }
 0x379   : > { %546 = vrot.lane.b32.xlu1 %v1926_v24, %s1763_s15  ;;  %s1428_s15 = sshll.u32 %s429_s30, 3 }
 0x3e9   : > { %v804_v16 = vpop.xlane.xlu1 %803 }
 0x3ea   : > { %v814_v17 = vsub.f32 %v798_v53, %v804_v16 }
 0x3ec   : > { %v818_v18 = vmul.f32 1.442695, %v814_v17 }
 0x3ee   : > { %1672 = vpow2.f32 %v818_v18 }
 0x3f1   : > { %v810_v19 = vpop.xlane.xlu1 %809  ;;  %v807_v20 = vpop.xlane.xlu0 %806 }
 0x3f2   : > { %v816_v21 = vsub.f32 %v800_v63, %v810_v19  ;;  %v815_v22 = vsub.f32 %v799_v1, %v807_v20 }
 0x3f4   : > { %v822_v23 = vmul.f32 1.442695, %v816_v21  ;;  %v820_v25 = vmul.f32 1.442695, %v815_v22 }
 0x3f5   : > { %v547_v26 = vpop.permute.xlu1 %546 }
 0x3f6   : > { %1674 = vpow2.f32 %v822_v23  ;;  %549 = vst.msk [vmem:[#allocation4] sm:$0xf] %vm537_vm2, %v547_v26 }
 0x3f7   : > { %1676 = vpow2.f32 %v820_v25 }
 0x3f9   : > { %v813_v27 = vpop.xlane.xlu0 %812 }
 0x3fa   : > { %v817_v28 = vsub.f32 %v801_v12, %v813_v27 }
 0x3fb   : > { %v1673_v29 = vpop.eup %1672 }
 0x3fc   : > { %v824_v30 = vmul.f32 1.442695, %v817_v28  ;;  %v826_v31 = vsel %vm609_vm3, %v1673_v29, 0.0 }
 0x3fd   : > { %827 = vadd.xlane.f32.xlu1 %v826_v31  ;;  %v850_v32 = vld [vmem:[#allocation4] sm:$0xf] }
 0x3fe   : > { %1678 = vpow2.f32 %v824_v30  ;;  %v859_v33 = vsel %vm857_vm5, %v850_v32, 0 }
 0x3ff   : > { %1542 = vmatpush3.bf16.msra.mxu1 %v859_v33 }
 0x400   : > { %1553 = vmatprep.subr.bf16.mxu1 %v1754_v8 }
 0x403   : > { %v1675_v34 = vpop.eup %1674 }
 0x404   : > { %v1677_v35 = vpop.eup %1676  ;;  %v832_v36 = vsel %vm609_vm3, %v1675_v34, 0.0 }
 0x405   : > { %833 = vadd.xlane.f32.xlu1 %v832_v36  ;;  %v829_v37 = vsel %vm609_vm3, %v1677_v35, 0.0 }
 0x406   : > { %830 = vadd.xlane.f32.xlu0 %v829_v37 }
 0x40b   : > { %v1679_v38 = vpop.eup %1678 }
 0x40c   : > { %v835_v39 = vsel %vm609_vm3, %v1679_v38, 0.0 }
 0x40d   : > { %836 = vadd.xlane.f32.xlu0 %v835_v39 }
 0x416   : > { %575 = vrot.lane.b32.xlu1 %v1926_v24, %s1764_s16  ;;  %s1768_s16 = smov 8  }
 0x41a   : > { %590 = vrot.lane.b32.xlu1 %v1926_v24, %s1765_s20  ;;  %s1769_s20 = smov 24  }
 0x423   : > { %560 = vrot.lane.b32.xlu0 %v1926_v24, %s1766_s21  ;;  %s1468_s21 = sshll.u32 %s1862_s29, 7  ;;  %s1352_s29 = scalar_lea.sflag [#allocation7], %s429_s30 }
 0x424   : > { %s2080_s1 = scalar_lea.hbm %s2135_s13, %s1468_s21 }
 0x486   : > { %v828_v40 = vpop.xlane.xlu1 %827 }
 0x487   : > { %1680 = vrcp.f32 %v828_v40 }
 0x48e   : > { %v834_v41 = vpop.xlane.xlu1 %833 }
 0x48f   : > { %1682 = vrcp.f32 %v834_v41  ;;  %v831_v42 = vpop.xlane.xlu0 %830 }
 0x490   : > { %1684 = vrcp.f32 %v831_v42  ;;  %v1660_v42 = vld [vmem:[%s2131_s9 + $0x8] sm:$0xff]  }
 0x492   : > { %v576_v43 = vpop.permute.xlu1 %575 }
 0x493   : > { %579 = vst.msk [vmem:[#allocation4 + $0x8] sm:$0xf] %vm537_vm2, %v576_v43  ;;  %v1662_v43 = vld [vmem:[%s2133_s11 + $0x38] sm:$0xff]  }
 0x494   : > { %v1681_v44 = vpop.eup %1680 }
 0x495   : > { %v842_v45 = vmul.f32 %v1681_v44, %v1673_v29  ;;  %v1448_v29 = vld [vmem:[%s2128_s6] ss:$0 sm:$0xff]  ;;  %v1663_v44 = vld [vmem:[%s2133_s11 + $0x30] sm:$0xff]  }
 0x496   : > { %v591_v46 = vpop.permute.xlu1 %590  ;;  %v837_v47 = vpop.xlane.xlu0 %836 }
 0x497   : > { %594 = vst.msk [vmem:[#allocation4 + $0xc] sm:$0xf] %vm537_vm2, %v591_v46  ;;  %v846_v48 = vpack.c.bf16 %v842_v45, %v842_v45  ;;  %1686 = vrcp.f32 %v837_v47 }
 0x499   : > { %1544 = vmatmul.mubr.msk.bf16.vlgmr.msra.gmra.mxu1 %vm609_vm3, %v846_v48 }
 0x49a   : > { %v561_v24 = vpop.permute.xlu0 %560  ;;  %v852_v49 = vld [vmem:[#allocation4 + $0x8] sm:$0xf]  ;;  %1555 = vmatprep.mubr.msk.bf16.mxu1 %vm1755_vm1, %v1754_v8 }
 0x49b   : > { %564 = vst.msk [vmem:[#allocation4 + $0x4] sm:$0xf] %vm537_vm2, %v561_v24  ;;  %v951_v50 = vsel %vm857_vm5, %v852_v49, 0  ;;  %v1452_v24 = vld [vmem:[%s2129_s7] ss:$0 sm:$0xff] }
 0x49c   : > { %v1683_v51 = vpop.eup %1682  ;;  %1554 = vmatpush3.bf16.msra.mxu1 %v951_v50  ;;  %v1453_v50 = vld [vmem:[%s2130_s8] ss:$0 sm:$0xff] }
 0x49d   : > { %v844_v52 = vmul.f32 %v1683_v51, %v1675_v34  ;;  %1565 = vmatprep.subr.bf16.mxu1 %v1754_v8  ;;  %v1685_v53 = vpop.eup %1684 }
 0x49e   : > { %v843_v55 = vmul.f32 %v1685_v53, %v1677_v35  ;;  %v853_v58 = vld [vmem:[#allocation4 + $0xc] sm:$0xf] }
 0x49f   : > { %v848_v54 = vpack.c.bf16 %v844_v52, %v844_v52  ;;  %v997_v61 = vsel %vm857_vm5, %v853_v58, 0  ;;  %v1668_v58 = vld [vmem:[%s2133_s11 + $0x8] sm:$0xff]  }
 0x4a0   : > { %v847_v59 = vpack.c.bf16 %v843_v55, %v843_v55  ;;  %v1665_v55 = vld [vmem:[%s2133_s11 + $0x20] sm:$0xff]  }
 0x4a1   : > { %1556 = vmatmul.mubr.msk.bf16.vlgmr.msra.gmra.mxu1 %vm609_vm3, %v848_v54  ;;  %v1664_v54 = vld [vmem:[%s2133_s11 + $0x28] sm:$0xff]  }
 0x4a2   : > { %v851_v56 = vld [vmem:[#allocation4 + $0x4] sm:$0xf]  ;;  %1569 = vmatprep.mubr.msk.bf16.mxu1 %vm1755_vm1, %v1754_v8  ;;  %1566 = vmatpush3.bf16.msra.mxu1 %v1658_v11 }
 0x4a3   : > { %v905_v57 = vsel %vm857_vm5, %v851_v56, 0  ;;  %1567 = vmatprep.subr.bf16.mxu1 %v1754_v8  ;;  %v1666_v56 = vld [vmem:[%s2133_s11 + $0x18] sm:$0xff]  }
 0x4a4   : > { %1548 = vmatpush3.bf16.msra.mxu0 %v905_v57  ;;  %v1687_v60 = vpop.eup %1686  ;;  %v1667_v57 = vld [vmem:[%s2133_s11 + $0x10] sm:$0xff]  }
 0x4a5   : > { %1559 = vmatprep.subr.bf16.mxu0 %v1754_v8  ;;  %v845_v62 = vmul.f32 %v1687_v60, %v1679_v38  ;;  %v1454_v60 = vld [vmem:[%s2132_s10] ss:$0 sm:$0xff] }
 0x4a6   : > { %1568 = vmatpush3.bf16.msra.mxu1 %v1659_v14 }
 0x4a7   : > { %1550 = vmatmul.mubr.msk.bf16.vlgmr.msra.gmra.mxu0 %vm609_vm3, %v847_v59  ;;  %v849_v63 = vpack.c.bf16 %v845_v62, %v845_v62  ;;  %1581 = vmatprep.subr.bf16.mxu1 %v1754_v8  ;;  %v1669_v59 = vld [vmem:[%s2133_s11] sm:$0xff]  }
 0x4a8   : > { %1560 = vmatpush3.bf16.msra.mxu0 %v997_v61  ;;  %1561 = vmatprep.mubr.msk.bf16.mxu0 %vm1755_vm1, %v1754_v8 }
 0x4a9   : > { %1573 = vmatprep.subr.bf16.mxu0 %v1754_v8 }
 0x4af   : > { %1562 = vmatmul.mubr.msk.bf16.vlgmr.msra.gmra.mxu0 %vm609_vm3, %v849_v63 }
 0x4b0   : > { %1577 = vmatprep.mubr.msk.bf16.mxu0 %vm1755_vm1, %v1754_v8  ;;  %1574 = vmatpush3.bf16.msra.mxu0 %v1660_v42 }
 0x4b1   : > { %1575 = vmatprep.subr.bf16.mxu0 %v1754_v8 }
 0x559   : > { %v895_v1 = vpop.f32.mrf.mxu1 }
 0x55a   : > { %v1039_v2 = vpack.c.bf16 %v895_v1, %v895_v1 }
 0x55b   : > { %v1545_v3 = vpop.f32.mrf.mxu1 }
 0x55c   : > { %1040 = vst.msk [vmem:[#allocation5] sm:$0xf] %vm537_vm2, %v1039_v2 }
 0x55d   : > { %v898_v4 = vpop.f32.mrf.mxu1 }
 0x55f   : > { %v1546_v5 = vpop.f32.mrf.mxu1 }
 0x561   : > { %v987_v6 = vpop.f32.mrf.mxu1 }
 0x562   : > { %v1473_v7 = vpack.c.bf16 %v987_v6, %v987_v6 }
 0x563   : > { %v1557_v9 = vpop.f32.mrf.mxu1 }
 0x564   : > { %1054 = vrot.lane.b32.xlu1 %v1473_v7, %s1767_s22  ;;  %v1458_v9 = vld [vmem:[%s2134_s12] ss:$0 sm:$0xff]  ;;  %s431_s22 = scalar_lea.vmem [#allocation6], %s1428_s15 }
 0x565   : > { %v990_v10 = vpop.f32.mrf.mxu1  ;;  %s1365_s23 = sshll.u32 %s431_s22, 4  ;;  %s2082_s23 = int_to_ptr.vmem [resolvable:$true] %s1365_s23 }
 0x566   : > { %s1692_s15 = scalar_lea.vmem %s2082_s23, 128 }
 0x567   : > { %v941_v12 = vpop.f32.mrf.mxu0  ;;  %v1558_v13 = vpop.f32.mrf.mxu1  ;;  %p1693_p11 = scmp.ne.s32.totalorder %s2082_s23, %s1692_s15 }
 0x568   : > { %v1472_v15 = vpack.c.bf16 %v941_v12, %v941_v12 }
 0x569   : > { %v1551_v16 = vpop.f32.mrf.mxu0  ;;  %p1694_p12 = pnand %p1693_p11, %p1879_p5 }
 0x56a   : > { %1045 = vrot.lane.b32.xlu0 %v1472_v15, %s1768_s16  ;;  %s1770_s16 = smov [#allocation6]  }
 0x56b   : > { %v944_v17 = vpop.f32.mrf.mxu0  ;;  %p1695_p13 = pneg %p1694_p12 }
 0x56d   : > { %v1552_v18 = vpop.f32.mrf.mxu0 }
 0x56f   : > { %v1033_v19 = vpop.f32.mrf.mxu0 }
 0x570   : > { %v1474_v20 = vpack.c.bf16 %v1033_v19, %v1033_v19 }
 0x571   : > { %v1563_v21 = vpop.f32.mrf.mxu0 }
 0x572   : > { %1063 = vrot.lane.b32.xlu0 %v1474_v20, %s1769_s20  ;;  %s1696_s20 = sshll.u32 %s1770_s16, 4  ;;  %s1697_s20 = int_to_ptr.vmem [resolvable:$false] %s1696_s20 }
 0x573   : > { %v1036_v22 = vpop.f32.mrf.mxu0  ;;  %s1698_s0 = scalar_lea.vmem %s1697_s20, 256  ;;  %p1699_p0 = scmp.lt.s32.totalorder %s2082_s23, %s1697_s20 }
 0x574   : > { %p1700_p1 = scmp.lt.s32.totalorder %s1698_s0, %s1692_s15 }
 0x575   : > { %v1564_v23 = vpop.f32.mrf.mxu0 }
 0x576   : > { %p1701_p2 = por %p1700_p1, %p1699_p0 }
 0x578   : > { %p1702_p3 = pnand %p1701_p2, %p1695_p13 }
 0x5d6   : > { %v1055_v26 = vpop.permute.xlu1 %1054 }
 0x5dc   : > { %v1046_v25 = vpop.permute.xlu0 %1045 }
 0x5dd   : > { %1049 = vst.msk [vmem:[#allocation5] sm:$0xf] %vm1048_vm6, %v1046_v25 }
 0x5de   : > { %1058 = vst.msk [vmem:[#allocation5] sm:$0xf] %vm1057_vm7, %v1055_v26 }
 0x5e4   : > { %v1064_v27 = vpop.permute.xlu0 %1063 }
 0x5e5   : > { %1067 = vst.msk [vmem:[#allocation5] sm:$0xf] %vm1066_vm8, %v1064_v27 }
 0x5ec   : > { %v1068_v28 = vld [vmem:[#allocation5] sm:$0xf] }
 0x5ed   : > { %1570 = vmatmul.mubr.msk.bf16.vlgmr.msra.gmra.mxu1 %vm438_vm0, %v1068_v28 }
 0x5ee   : > { %1597 = vmatprep.mubr.msk.bf16.mxu1 %vm1755_vm1, %v1754_v8  ;;  %1582 = vmatpush3.bf16.msra.mxu1 %v1662_v43 }
 0x5ef   : > { %1583 = vmatprep.subr.bf16.mxu1 %v1754_v8 }
 0x5f2   : > { %1584 = vmatpush3.bf16.msra.mxu1 %v1663_v44 }
 0x5f3   : > { %1585 = vmatprep.subr.bf16.mxu1 %v1754_v8 }
 0x5f6   : > { %1586 = vmatpush3.bf16.msra.mxu1 %v1664_v54 }
 0x5f7   : > { %1587 = vmatprep.subr.bf16.mxu1 %v1754_v8 }
 0x5fa   : > { %1588 = vmatpush3.bf16.msra.mxu1 %v1665_v55 }
 0x5fb   : > { %1589 = vmatprep.subr.bf16.mxu1 %v1754_v8 }
 0x5fe   : > { %1590 = vmatpush3.bf16.msra.mxu1 %v1666_v56 }
 0x5ff   : > { %1591 = vmatprep.subr.bf16.mxu1 %v1754_v8 }
 0x602   : > { %1592 = vmatpush3.bf16.msra.mxu1 %v1667_v57 }
 0x603   : > { %1593 = vmatprep.subr.bf16.mxu1 %v1754_v8 }
 0x606   : > { %1594 = vmatpush3.bf16.msra.mxu1 %v1668_v58 }
 0x607   : > { %1595 = vmatprep.subr.bf16.mxu1 %v1754_v8 }
 0x60a   : > { %1596 = vmatpush3.bf16.msra.mxu1 %v1669_v59 }
 0x6ad   : > { %v1129_v30 = vpop.f32.mrf.mxu1 }
 0x6ae   : > { %v1130_v31 = vadd.f32 %v1448_v29, %v1129_v30 }
 0x6af   : > { %v1571_v32 = vpop.f32.mrf.mxu1 }
 0x6b0   : > { %v2017_v33 = vadd.f32 %v1130_v31, %v1894_v0  ;;  %v1661_v0 = vld [vmem:[%s2131_s9] sm:$0xff]  }
 0x6b1   : > { %v1132_v34 = vpop.f32.mrf.mxu1  ;;  %1576 = vmatpush3.bf16.msra.mxu0 %v1661_v0 }
 0x6b2   : > { %v1136_v35 = vsel %vm438_vm0, %v2017_v33, 0.0 }
 0x6b3   : > { %1137 = vadd.xlane.f32.xlu1 %v1136_v35  ;;  %v1572_v36 = vpop.f32.mrf.mxu1 }
 0x73c   : > { %v1138_v37 = vpop.xlane.xlu1 %1137 }
 0x73d   : > { %v1139_v38 = vmul.f32 0.03125, %v1138_v37 }
 0x73f   : > { %v1140_v39 = vsub.f32 %v2017_v33, %v1139_v38 }
 0x741   : > { %v1141_v40 = vmul.f32 %v1140_v39, %v1140_v39 }
 0x743   : > { %v1142_v41 = vsel %vm438_vm0, %v1141_v40, 0.0 }
 0x744   : > { %1143 = vadd.xlane.f32.xlu0 %v1142_v41 }
 0x7cd   : > { %v1144_v45 = vpop.xlane.xlu0 %1143 }
 0x7ce   : > { %v1145_v46 = vmul.f32 0.03125, %v1144_v45 }
 0x7d0   : > { %v1146_v47 = vadd.f32 1e-05, %v1145_v46 }
 0x7d2   : > { %1688 = vrsqrt.f32 %v1146_v47 }
 0x7df   : > { %v1689_v48 = vpop.eup %1688 }
 0x7e0   : > { %v1148_v49 = vmul.f32 %v1689_v48, %v1140_v39 }
 0x7e2   : > { %v1156_v51 = vmul.f32 %v1452_v24, %v1148_v49 }
 0x7e4   : > { %v1164_v52 = vadd.f32 %v1453_v50, %v1156_v51 }
 0x7e6   : > { %v1165_v53 = vpack.c.bf16 %v1164_v52, %v1164_v52 }
 0x7e8   : > { %1578 = vmatmul.mubr.msk.bf16.vlgmr.msra.gmra.mxu0 %vm438_vm0, %v1165_v53 }
 0x8a8   : > { %v1226_v61 = vpop.f32.mrf.mxu0 }
 0x8a9   : > { %v1227_v62 = vadd.f32 %v1454_v60, %v1226_v61 }
 0x8aa   : > { %v1579_v63 = vpop.f32.mrf.mxu0 }
 0x8ab   : > { %v1233_v1 = vmul.f32 0.70710677, %v1227_v62  ;;  %v1232_v8 = vmul.f32 0.5, %v1227_v62 }
 0x8ac   : > { %v1229_v2 = vpop.f32.mrf.mxu0 }
 0x8ad   : > { %1690 = verf.f32 %v1233_v1 }
 0x8ae   : > { %v1580_v3 = vpop.f32.mrf.mxu0 }
 0x8ba   : > { %v1691_v4 = vpop.eup %1690 }
 0x8bb   : > { %v1235_v5 = vadd.f32 1.0, %v1691_v4 }
 0x8bd   : > { %v1236_v6 = vmul.f32 %v1235_v5, %v1232_v8 }
 0x8bf   : > { %v1237_v7 = vpack.c.bf16 %v1236_v6, %v1236_v6 }
 0x8c1   : > { %1598 = vmatmul.mubr.bf16.vlgmr.msra.gmra.mxu1 %v1237_v7 }
 0x981   : > { %v1343_v10 = vpop.f32.mrf.mxu1 }
 0x982   : > { %v1344_v11 = vadd.f32 %v1458_v9, %v1343_v10 }
 0x983   : > { %v1599_v12 = vpop.f32.mrf.mxu1 }
 0x984   : > { %v1349_v13 = vadd.f32 %v1344_v11, %v2017_v33 }
 0x985   : > { %v1346_v14 = vpop.f32.mrf.mxu1 }
 0x986   : > { %1350 = vst.msk [vmem:[%s431_s22] sm:$0xff] %vm438_vm0, %v1349_v13 }
 0x987   : > { %v1600_v15 = vpop.f32.mrf.mxu1 }
 0x988   : > { %1705 = shalt.err (!%p1702_p3)
}
 0x989   : > { %s1706_s21 = scalar_lea.hbm %s2080_s1, 128  ;;  %s1710_s24 = scalar_lea.hbm %s2135_s13, 256 }
 0x98a   : > { %p1707_p4 = scmp.ne.s32.totalorder %s2080_s1, %s1706_s21  ;;  %p1711_p9 = scmp.lt.s32.totalorder %s2080_s1, %s2135_s13 }
 0x98b   : > { %p1712_p10 = scmp.lt.s32.totalorder %s1710_s24, %s1706_s21 }
 0x98c   : > { %p1708_p7 = pnand %p1707_p4, %p1879_p5 }
 0x98d   : > { %p1713_p11 = por %p1712_p10, %p1711_p9 }
 0x98e   : > { %p1709_p8 = pneg %p1708_p7 }
 0x990   : > { %p1714_p12 = pnand %p1713_p11, %p1709_p8 }
 0x992   : > { %1717 = shalt.err (!%p1714_p12)
}
 0x993   : > { %1601 = dma.vmem_to_hbm [thread:$0]  (%p1879_p5), %s2082_s23, 128, %s2080_s1, %s1352_s29  }
 0x994 PF: > { %p1607_p13 = scmp.ge.s32.totalorder %s1752_s28, 2  ;;  %s1377_s15 = sand.u32 1, %s1740_s25  }
 0x995   : > { %s1378_s2 = scalar_lea.sflag [#allocation7], %s1377_s15 }
 0x996   : > { %p1604_p0 = pnand %p1607_p13, %p1883_p6 }
 0x998   : > { %p1605_p1 = pneg %p1604_p0 }
 0x99a   : > { %1735 = dma.done.wait (%p1605_p1), %s1378_s2, 128  }
 0x99b   : > { %1737 = vsyncadd (%p1605_p1), %s1378_s2, 4294967168  ;;  %p23_p2 = scmp.ge.s32.totalorder %s1866_s14, 4   ;;  %s2144_s25 = smov %s1744_s26 }
 0x99c   : > { %s2145_s26 = smov %s1748_s27  ;;  %s2146_s27 = smov %s1877_s17 }
 0x99d   : > { %s2147_s28 = smov %s1866_s14  ;;  %25 = sbr.rel (!%p23_p2) target bundleno = 7 (0x7), region = 116 }
 0x9a2   :  { %1383 = vsyncpa [#allocation7], 1 }
 0x9a3   :  { %1385 = vsyncpa [#allocation7 + $0x1], 1 }

</bundles_post_ra>
